<compile_context>
chip_gen: v5e
topology: v5e:2x2
jax: 0.10.0
libtpu: 0.0.40
codegen_flags: <defaults>
</compile_context>

<pallas_src>
import functools

import jax
import jax.numpy as jnp
import numpy as np
from jax import lax
from jax.experimental import pallas as pl
from jax.experimental.pallas import tpu as pltpu

LANE = 128
# Set to jnp.bfloat16 for 2-4x MXU throughput on v6e/v7x (tolerance is relaxed
# automatically in __main__); default f32 keeps the strict 1e-4 check.
_MXU_DTYPE = jnp.float32


def _round_up(x, m):
    return (x + m - 1) // m * m


def _vmem_capacity_bytes():
    try:
        return int(pltpu.get_tpu_info().vmem_capacity_bytes)
    except Exception:
        return 64 * 1024 * 1024          # v7x-safe fallback

# Scoped VMEM limit + sizing budget derived from the hardware, with headroom.
_VMEM_LIMIT = min(_vmem_capacity_bytes(), 128 * 1024 * 1024) * 3 // 4
_SIZING_BUDGET = _VMEM_LIMIT * 9 // 10


def _pick_tile_m(m, kd, cp, in_bytes):
    """Largest row tile (multiple of 8, <= 2048) whose working set fits VMEM."""
    m8 = _round_up(m, 8)
    # resident conv output (upper bound incl. pad) + double-buffered weights
    # + the (1, Cp) vector scratch/operands.
    fixed = (m8 + 2048) * cp * 4 + 2 * kd * cp * in_bytes + 16 * cp * 4
    per_row = 2 * (kd * in_bytes + cp * 4)   # double-buffered patch + out tiles
    avail = _SIZING_BUDGET - fixed
    if avail < per_row * 8:
        raise ValueError(
            "BasicBlock Pallas kernel: conv output does not fit in VMEM at this "
            "size. TODO(synk): spill y to HBM (two-call form) for large M.")
    tm = min(2048, avail // per_row, m8)
    return max(8, (tm // 8) * 8)


# ----------------------------- Pallas kernels -----------------------------

def _conv_bn_act_kernel(p_ref, w_ref, gamma_ref, beta_ref, o_ref,
                        y_vmem, sum_acc, sq_acc, *, m_total, tm, eps):
    """Fused conv-as-matmul + BN batch stats + BN affine + ReLU (two passes)."""
    p = pl.program_id(0)          # 0: matmul + stats, 1: affine + relu
    i = pl.program_id(1)          # M-tile index
    nt = pl.num_programs(1)

    @pl.when((p == 0) & (i == 0))
    def _init():
        sum_acc[...] = jnp.zeros_like(sum_acc)
        sq_acc[...] = jnp.zeros_like(sq_acc)

    @pl.when(p == 0)
    def _matmul_stats():
        y = jnp.dot(p_ref[...], w_ref[...], preferred_element_type=jnp.float32)
        row0 = pl.multiple_of(i * tm, tm)
        y_vmem[pl.ds(row0, tm), :] = y          # conv output stays in VMEM
        # Column reductions on the (otherwise idle) MXU instead of the XLU.
        ones_row = jnp.ones((1, tm), jnp.float32)
        sum_acc[...] += jnp.dot(ones_row, y, preferred_element_type=jnp.float32)
        sq_acc[...] += jnp.dot(ones_row, y * y, preferred_element_type=jnp.float32)

    @pl.when((p == 0) & (i == nt - 1))
    def _finalize():
        # Emit per-channel scale / bias (not mean / var): rsqrt happens once.
        inv_m = jnp.float32(1.0 / m_total)
        mu = sum_acc[...] * inv_m
        var = sq_acc[...] * inv_m - mu * mu     # biased variance
        scale = gamma_ref[...] * lax.rsqrt(var + eps)
        sum_acc[...] = scale                    # scratch reused: scale
        sq_acc[...] = beta_ref[...] - mu * scale  # scratch reused: bias

    @pl.when(p == 1)
    def _apply():
        row0 = pl.multiple_of(i * tm, tm)
        y = y_vmem[pl.ds(row0, tm), :]
        o_ref[...] = jnp.maximum(y * sum_acc[...] + sq_acc[...], 0.0)


def _conv_bn_shortcut_add_act_kernel(p_ref, w_ref, gamma_ref, beta_ref,
                                     xs_ref, ws_ref, o_ref,
                                     y_vmem, sum_acc, sq_acc,
                                     *, m_total, tm, eps):
    """Same as above, but pass 1 fuses the 1x1-stride-2 shortcut conv + add."""
    p = pl.program_id(0)
    i = pl.program_id(1)
    nt = pl.num_programs(1)

    @pl.when((p == 0) & (i == 0))
    def _init():
        sum_acc[...] = jnp.zeros_like(sum_acc)
        sq_acc[...] = jnp.zeros_like(sq_acc)

    @pl.when(p == 0)
    def _matmul_stats():
        y = jnp.dot(p_ref[...], w_ref[...], preferred_element_type=jnp.float32)
        row0 = pl.multiple_of(i * tm, tm)
        y_vmem[pl.ds(row0, tm), :] = y
        ones_row = jnp.ones((1, tm), jnp.float32)
        sum_acc[...] += jnp.dot(ones_row, y, preferred_element_type=jnp.float32)
        sq_acc[...] += jnp.dot(ones_row, y * y, preferred_element_type=jnp.float32)

    @pl.when((p == 0) & (i == nt - 1))
    def _finalize():
        inv_m = jnp.float32(1.0 / m_total)
        mu = sum_acc[...] * inv_m
        var = sq_acc[...] * inv_m - mu * mu
        scale = gamma_ref[...] * lax.rsqrt(var + eps)
        sum_acc[...] = scale
        sq_acc[...] = beta_ref[...] - mu * scale

    @pl.when(p == 1)
    def _apply():
        row0 = pl.multiple_of(i * tm, tm)
        y = y_vmem[pl.ds(row0, tm), :]
        # TODO(synk): for tiny C1 replace this lane-sparse matmul with C1
        # broadcast multiply-adds on the VPU.
        sc = jnp.dot(xs_ref[...], ws_ref[...], preferred_element_type=jnp.float32)
        o_ref[...] = jnp.maximum(y * sum_acc[...] + sq_acc[...] + sc, 0.0)


# ------------------------------ call wrappers -------------------------------

_VEC = lambda cp: pl.BlockSpec((1, cp), lambda p, i: (0, 0))


def fused_conv_bn_act(patches, w, gamma, beta, eps):
    """(M, Kd) @ (Kd, Cp) conv matmul + training-mode BN + ReLU, one call."""
    M, Kd = patches.shape
    Cp = w.shape[1]
    tm = _pick_tile_m(M, Kd, Cp, patches.dtype.itemsize)
    M_pad = _round_up(M, tm)
    if M_pad != M:
        patches = jnp.pad(patches, ((0, M_pad - M), (0, 0)))
    grid = (2, M_pad // tm)

    out = pl.pallas_call(
        functools.partial(_conv_bn_act_kernel, m_total=M, tm=tm, eps=eps),
        out_shape=jax.ShapeDtypeStruct((M_pad, Cp), jnp.float32),
        grid_spec=pltpu.PrefetchScalarGridSpec(
            num_scalar_prefetch=0,
            grid=grid,
            in_specs=[
                # patches streamed only on pass 0 (index frozen on pass 1)
                pl.BlockSpec((tm, Kd), lambda p, i: (i * (1 - p), 0)),
                pl.BlockSpec((Kd, Cp), lambda p, i: (0, 0)),
                _VEC(Cp), _VEC(Cp),
            ],
            # output written only on pass 1 (index frozen on pass 0)
            out_specs=pl.BlockSpec((tm, Cp), lambda p, i: (i * p, 0)),
            scratch_shapes=[pltpu.VMEM((M_pad, Cp), jnp.float32),
                            pltpu.VMEM((1, Cp), jnp.float32),
                            pltpu.VMEM((1, Cp), jnp.float32)]),
        compiler_params=pltpu.CompilerParams(
            dimension_semantics=("arbitrary", "arbitrary"),
            vmem_limit_bytes=_VMEM_LIMIT),
    )(patches, w, gamma, beta)
    return out[:M] if M_pad != M else out


def fused_conv_bn_shortcut_add_act(patches, w, gamma, beta, xs, ws, eps):
    """conv2 matmul + BN2 + fused shortcut conv + residual add + ReLU."""
    M, Kd = patches.shape
    Cp = w.shape[1]
    C1 = xs.shape[1]
    tm = _pick_tile_m(M, Kd, Cp, patches.dtype.itemsize)
    M_pad = _round_up(M, tm)
    if M_pad != M:
        patches = jnp.pad(patches, ((0, M_pad - M), (0, 0)))
        xs = jnp.pad(xs, ((0, M_pad - M), (0, 0)))
    grid = (2, M_pad // tm)

    out = pl.pallas_call(
        functools.partial(_conv_bn_shortcut_add_act_kernel,
                          m_total=M, tm=tm, eps=eps),
        out_shape=jax.ShapeDtypeStruct((M_pad, Cp), jnp.float32),
        grid_spec=pltpu.PrefetchScalarGridSpec(
            num_scalar_prefetch=0,
            grid=grid,
            in_specs=[
                pl.BlockSpec((tm, Kd), lambda p, i: (i * (1 - p), 0)),
                pl.BlockSpec((Kd, Cp), lambda p, i: (0, 0)),
                _VEC(Cp), _VEC(Cp),
                # shortcut operands only needed on pass 1
                pl.BlockSpec((tm, C1), lambda p, i: (i * p, 0)),
                pl.BlockSpec((C1, Cp), lambda p, i: (0, 0)),
            ],
            out_specs=pl.BlockSpec((tm, Cp), lambda p, i: (i * p, 0)),
            scratch_shapes=[pltpu.VMEM((M_pad, Cp), jnp.float32),
                            pltpu.VMEM((1, Cp), jnp.float32),
                            pltpu.VMEM((1, Cp), jnp.float32)]),
        compiler_params=pltpu.CompilerParams(
            dimension_semantics=("arbitrary", "arbitrary"),
            vmem_limit_bytes=_VMEM_LIMIT),
    )(patches, w, gamma, beta, xs, ws)
    return out[:M] if M_pad != M else out


# ------------------------------- JAX glue ----------------------------------

def im2col(x_nhwc, ksize, stride, padding):
    """Extract conv patches. Returns (N*Ho*Wo, k*k*C) and output spatial dims.

    TODO(synk): replace with in-kernel patch construction (per-tap matmul
    accumulation on a DMA'd padded row band) to avoid the 9x HBM expansion.
    """
    N, H, W, C = x_nhwc.shape
    xp = jnp.pad(x_nhwc, ((0, 0), (padding, padding), (padding, padding), (0, 0)))
    Ho = (H + 2 * padding - ksize) // stride + 1
    Wo = (W + 2 * padding - ksize) // stride + 1
    cols = []
    for dh in range(ksize):
        for dw in range(ksize):
            cols.append(xp[:, dh:dh + stride * Ho:stride,
                           dw:dw + stride * Wo:stride, :])
    p = jnp.stack(cols, axis=3)  # (N, Ho, Wo, k*k, C)
    return p.reshape(N * Ho * Wo, ksize * ksize * C), (N, Ho, Wo)


def basic_block_forward(x_nchw, params, stride1=1, stride2=2, eps=1e-5):
    # NCHW (PyTorch) -> NHWC (kernel layout)
    x = jnp.transpose(x_nchw, (0, 2, 3, 1)).astype(jnp.float32)
    N, H, W, C1 = x.shape
    C2 = params["c_out"]

    # conv1 (3x3, stride2, pad1, no bias) + BN1 batch stats + affine + ReLU
    p1, (n, h1, w1) = im2col(x, 3, stride2, 1)
    o1 = fused_conv_bn_act(p1.astype(_MXU_DTYPE), params["w1_mat"],
                           params["gamma1"], params["beta1"], eps)

    # conv2 (3x3, stride1, pad1, no bias) + BN2 + shortcut + add + ReLU
    o1_img = o1[:, :C2].reshape(n, h1, w1, C2)
    p2, (_, h2, w2) = im2col(o1_img, 3, stride1, 1)
    xs = x[:, ::stride2, ::stride2, :].reshape(-1, C1)
    out = fused_conv_bn_shortcut_add_act(
        p2.astype(_MXU_DTYPE), params["w2_mat"], params["gamma2"],
        params["beta2"], xs, params["ws_mat"], eps)

    out_img = out[:, :C2].reshape(n, h2, w2, C2)
    return jnp.transpose(out_img, (0, 3, 1, 2))  # back to NCHW


def reference_forward(x, w1, w2, ws, g1, b1, g2, b2,
                      stride1=1, stride2=2, eps=1e-5):
    """Pure-JAX reference mirroring the PyTorch training-mode forward."""
    def conv(a, w, s, p):
        return jax.lax.conv_general_dilated(
            a, w, (s, s), [(p, p), (p, p)],
            dimension_numbers=("NCHW", "OIHW", "NCHW"))

    def bn(y, g, b):
        m = y.mean(axis=(0, 2, 3), keepdims=True)
        v = y.var(axis=(0, 2, 3), keepdims=True)  # biased
        return (y - m) / jnp.sqrt(v + eps) * g.reshape(1, -1, 1, 1) \
            + b.reshape(1, -1, 1, 1)

    out = jax.nn.relu(bn(conv(x, w1, stride2, 1), g1, b1))
    out = bn(conv(out, w2, stride1, 1), g2, b2)
    out = out + conv(x, ws, stride2, 0)
    return jax.nn.relu(out)


# --------------------------------- main -------------------------------------

if __name__ == "__main__":
    key = jax.random.PRNGKey(0)
    k = jax.random.split(key, 8)

    N, C1, H, W = 2, 4, 16, 16
    C2 = 8
    Cp = _round_up(C2, LANE)  # lane-dense padded channel count (128)

    x = jax.random.normal(k[0], (N, C1, H, W), jnp.float32)
    w1 = jax.random.normal(k[1], (C2, C1, 3, 3), jnp.float32) * 0.2
    w2 = jax.random.normal(k[2], (C2, C2, 3, 3), jnp.float32) * 0.2
    ws = jax.random.normal(k[3], (C2, C1, 1, 1), jnp.float32) * 0.2
    gamma1 = 1.0 + 0.1 * jax.random.normal(k[4], (C2,), jnp.float32)
    beta1 = 0.1 * jax.random.normal(k[5], (C2,), jnp.float32)
    gamma2 = 1.0 + 0.1 * jax.random.normal(k[6], (C2,), jnp.float32)
    beta2 = 0.1 * jax.random.normal(k[7], (C2,), jnp.float32)

    def pad_cout(m):       # pad output channels (last dim) to the 128-lane width
        return jnp.pad(m, ((0, 0), (0, Cp - C2)))

    def pad_vec(v):
        return jnp.pad(v.reshape(1, C2), ((0, 0), (0, Cp - C2)))

    params = {
        "c_out": C2,
        # OIHW -> (kh*kw*Cin, Cout), matching im2col (kh, kw, Cin) flattening,
        # with Cout zero-padded to 128 lanes (padded lanes stay exactly zero
        # through BN/ReLU because gamma/beta are zero-padded too).
        "w1_mat": pad_cout(jnp.transpose(w1, (2, 3, 1, 0))
                           .reshape(9 * C1, C2)).astype(_MXU_DTYPE),
        "w2_mat": pad_cout(jnp.transpose(w2, (2, 3, 1, 0))
                           .reshape(9 * C2, C2)).astype(_MXU_DTYPE),
        "ws_mat": pad_cout(jnp.transpose(ws, (2, 3, 1, 0)).reshape(C1, C2)),
        "gamma1": pad_vec(gamma1), "beta1": pad_vec(beta1),
        "gamma2": pad_vec(gamma2), "beta2": pad_vec(beta2),
    }

    out = basic_block_forward(x, params)
    out = jax.block_until_ready(out)

    ref = reference_forward(x, w1, w2, ws, gamma1, beta1, gamma2, beta2)
    tol = 1e-4 if _MXU_DTYPE == jnp.float32 else 2e-2  # deliberate bf16 slack
    np.testing.assert_allclose(np.asarray(out), np.asarray(ref),
                               rtol=tol, atol=tol)
    print("KERNEL_OK")
</pallas_src>

<mosaic_0001>
module attributes {stable_mosaic.version = 11 : i64} {
  func.func @_conv_bn_act_kernel(%arg0: i32, %arg1: i32, %arg2: memref<128x36xf32, #tpu.memory_space<vmem>>, %arg3: memref<36x128xf32, #tpu.memory_space<vmem>>, %arg4: memref<1x128xf32, #tpu.memory_space<vmem>>, %arg5: memref<1x128xf32, #tpu.memory_space<vmem>>, %arg6: memref<128x128xf32, #tpu.memory_space<vmem>>, %arg7: memref<128x128xf32, #tpu.memory_space<vmem>>, %arg8: memref<1x128xf32, #tpu.memory_space<vmem>>, %arg9: memref<1x128xf32, #tpu.memory_space<vmem>>) attributes {dimension_semantics = [#tpu.dimension_semantics<arbitrary>, #tpu.dimension_semantics<arbitrary>], iteration_bounds = array<i64: 2, 1>, scalar_prefetch = 0 : i64, scratch_operands = 3 : i64, tpu.core_type = #tpu.core_type<tc>, window_params = [{transform_indices = @transform_0, window_bounds = array<i64: 128, 36>}, {pipeline_mode = #tpu.pipeline_mode<synchronous>, transform_indices = @transform_1, window_bounds = array<i64: 36, 128>}, {pipeline_mode = #tpu.pipeline_mode<synchronous>, transform_indices = @transform_2, window_bounds = array<i64: 1, 128>}, {pipeline_mode = #tpu.pipeline_mode<synchronous>, transform_indices = @transform_3, window_bounds = array<i64: 1, 128>}, {transform_indices = @transform_4, window_bounds = array<i64: 128, 128>}]} {
    %c0_i32 = arith.constant 0 : i32
    %0 = arith.cmpi eq, %arg0, %c0_i32 : i32
    %c0_i32_0 = arith.constant 0 : i32
    %1 = arith.cmpi eq, %arg1, %c0_i32_0 : i32
    %2 = arith.andi %0, %1 : i1
    %3 = arith.extui %2 : i1 to i32
    %c0_i32_1 = arith.constant 0 : i32
    %4 = arith.cmpi ne, %3, %c0_i32_1 : i32
    scf.if %4 {
      %cst = arith.constant 0.000000e+00 : f32
      %16 = vector.broadcast %cst : f32 to vector<1x128xf32>
      %c0 = arith.constant 0 : index
      %c0_8 = arith.constant 0 : index
      %17 = vector.load %arg8[%c0, %c0_8] : memref<1x128xf32, #tpu.memory_space<vmem>>, vector<1x128xf32>
      tpu.vector_store %arg8[%c0, %c0_8], %16 {strides = array<i32>} : memref<1x128xf32, #tpu.memory_space<vmem>>, vector<1x128xf32>,
      %cst_9 = arith.constant 0.000000e+00 : f32
      %18 = vector.broadcast %cst_9 : f32 to vector<1x128xf32>
      %c0_10 = arith.constant 0 : index
      %c0_11 = arith.constant 0 : index
      %19 = vector.load %arg9[%c0_10, %c0_11] : memref<1x128xf32, #tpu.memory_space<vmem>>, vector<1x128xf32>
      tpu.vector_store %arg9[%c0_10, %c0_11], %18 {strides = array<i32>} : memref<1x128xf32, #tpu.memory_space<vmem>>, vector<1x128xf32>,
    } else {
    }
    %c0_i32_2 = arith.constant 0 : i32
    %5 = arith.cmpi eq, %arg0, %c0_i32_2 : i32
    %6 = arith.extui %5 : i1 to i32
    %c0_i32_3 = arith.constant 0 : i32
    %7 = arith.cmpi ne, %6, %c0_i32_3 : i32
    scf.if %7 {
      %c0 = arith.constant 0 : index
      %c0_8 = arith.constant 0 : index
      %16 = vector.load %arg2[%c0, %c0_8] : memref<128x36xf32, #tpu.memory_space<vmem>>, vector<128x36xf32>
      %c0_9 = arith.constant 0 : index
      %c0_10 = arith.constant 0 : index
      %17 = vector.load %arg3[%c0_9, %c0_10] : memref<36x128xf32, #tpu.memory_space<vmem>>, vector<36x128xf32>
      %cst = arith.constant dense<0.000000e+00> : vector<128x128xf32>
      %18 = tpu.matmul %16, %17, %cst {dimension_numbers = #tpu.dot_dimension_numbers<[1], [0], [0], [1], [0, 0, 1, 1], [], []>} : vector<128x36xf32>, vector<36x128xf32>, vector<128x128xf32> -> vector<128x128xf32>
      %c128_i32 = arith.constant 128 : i32
      %19 = arith.muli %arg1, %c128_i32 : i32
      %20 = tpu.assume_multiple %19, 128 : i32
      %21 = arith.index_cast %20 : i32 to index
      %c0_11 = arith.constant 0 : index
      %22 = vector.load %arg7[%21, %c0_11] : memref<128x128xf32, #tpu.memory_space<vmem>>, vector<128x128xf32>
      tpu.vector_store %arg7[%21, %c0_11], %18 {strides = array<i32>} : memref<128x128xf32, #tpu.memory_space<vmem>>, vector<128x128xf32>,
      %cst_12 = arith.constant 1.000000e+00 : f32
      %23 = vector.broadcast %cst_12 : f32 to vector<1x128xf32>
      %c0_13 = arith.constant 0 : index
      %c0_14 = arith.constant 0 : index
      %24 = vector.load %arg8[%c0_13, %c0_14] : memref<1x128xf32, #tpu.memory_space<vmem>>, vector<1x128xf32>
      %cst_15 = arith.constant dense<0.000000e+00> : vector<1x128xf32>
      %25 = tpu.matmul %23, %18, %cst_15 {dimension_numbers = #tpu.dot_dimension_numbers<[1], [0], [0], [1], [0, 0, 1, 1], [], []>} : vector<1x128xf32>, vector<128x128xf32>, vector<1x128xf32> -> vector<1x128xf32>
      %26 = arith.addf %24, %25 : vector<1x128xf32>
      %c0_16 = arith.constant 0 : index
      %c0_17 = arith.constant 0 : index
      %27 = vector.load %arg8[%c0_16, %c0_17] : memref<1x128xf32, #tpu.memory_space<vmem>>, vector<1x128xf32>
      tpu.vector_store %arg8[%c0_16, %c0_17], %26 {strides = array<i32>} : memref<1x128xf32, #tpu.memory_space<vmem>>, vector<1x128xf32>,
      %c0_18 = arith.constant 0 : index
      %c0_19 = arith.constant 0 : index
      %28 = vector.load %arg9[%c0_18, %c0_19] : memref<1x128xf32, #tpu.memory_space<vmem>>, vector<1x128xf32>
      %29 = arith.mulf %18, %18 : vector<128x128xf32>
      %cst_20 = arith.constant dense<0.000000e+00> : vector<1x128xf32>
      %30 = tpu.matmul %23, %29, %cst_20 {dimension_numbers = #tpu.dot_dimension_numbers<[1], [0], [0], [1], [0, 0, 1, 1], [], []>} : vector<1x128xf32>, vector<128x128xf32>, vector<1x128xf32> -> vector<1x128xf32>
      %31 = arith.addf %28, %30 : vector<1x128xf32>
      %c0_21 = arith.constant 0 : index
      %c0_22 = arith.constant 0 : index
      %32 = vector.load %arg9[%c0_21, %c0_22] : memref<1x128xf32, #tpu.memory_space<vmem>>, vector<1x128xf32>
      tpu.vector_store %arg9[%c0_21, %c0_22], %31 {strides = array<i32>} : memref<1x128xf32, #tpu.memory_space<vmem>>, vector<1x128xf32>,
    } else {
    }
    %c0_i32_4 = arith.constant 0 : i32
    %8 = arith.cmpi eq, %arg0, %c0_i32_4 : i32
    %c0_i32_5 = arith.constant 0 : i32
    %9 = arith.cmpi eq, %arg1, %c0_i32_5 : i32
    %10 = arith.andi %8, %9 : i1
    %11 = arith.extui %10 : i1 to i32
    %c0_i32_6 = arith.constant 0 : i32
    %12 = arith.cmpi ne, %11, %c0_i32_6 : i32
    scf.if %12 {
      %c0 = arith.constant 0 : index
      %c0_8 = arith.constant 0 : index
      %16 = vector.load %arg8[%c0, %c0_8] : memref<1x128xf32, #tpu.memory_space<vmem>>, vector<1x128xf32>
      %cst = arith.constant 7.812500e-03 : f32
      %17 = vector.broadcast %cst : f32 to vector<1x128xf32>
      %18 = arith.mulf %16, %17 : vector<1x128xf32>
      %c0_9 = arith.constant 0 : index
      %c0_10 = arith.constant 0 : index
      %19 = vector.load %arg9[%c0_9, %c0_10] : memref<1x128xf32, #tpu.memory_space<vmem>>, vector<1x128xf32>
      %cst_11 = arith.constant 7.812500e-03 : f32
      %20 = vector.broadcast %cst_11 : f32 to vector<1x128xf32>
      %21 = arith.mulf %19, %20 : vector<1x128xf32>
      %22 = arith.mulf %18, %18 : vector<1x128xf32>
      %23 = arith.subf %21, %22 : vector<1x128xf32>
      %c0_12 = arith.constant 0 : index
      %c0_13 = arith.constant 0 : index
      %24 = vector.load %arg4[%c0_12, %c0_13] : memref<1x128xf32, #tpu.memory_space<vmem>>, vector<1x128xf32>
      %cst_14 = arith.constant 9.99999974E-6 : f32
      %25 = vector.broadcast %cst_14 : f32 to vector<1x128xf32>
      %26 = arith.addf %23, %25 : vector<1x128xf32>
      %27 = math.rsqrt %26 : vector<1x128xf32>
      %28 = arith.mulf %24, %27 : vector<1x128xf32>
      %c0_15 = arith.constant 0 : index
      %c0_16 = arith.constant 0 : index
      %29 = vector.load %arg8[%c0_15, %c0_16] : memref<1x128xf32, #tpu.memory_space<vmem>>, vector<1x128xf32>
      tpu.vector_store %arg8[%c0_15, %c0_16], %28 {strides = array<i32>} : memref<1x128xf32, #tpu.memory_space<vmem>>, vector<1x128xf32>,
      %c0_17 = arith.constant 0 : index
      %c0_18 = arith.constant 0 : index
      %30 = vector.load %arg5[%c0_17, %c0_18] : memref<1x128xf32, #tpu.memory_space<vmem>>, vector<1x128xf32>
      %31 = arith.mulf %18, %28 : vector<1x128xf32>
      %32 = arith.subf %30, %31 : vector<1x128xf32>
      %c0_19 = arith.constant 0 : index
      %c0_20 = arith.constant 0 : index
      %33 = vector.load %arg9[%c0_19, %c0_20] : memref<1x128xf32, #tpu.memory_space<vmem>>, vector<1x128xf32>
      tpu.vector_store %arg9[%c0_19, %c0_20], %32 {strides = array<i32>} : memref<1x128xf32, #tpu.memory_space<vmem>>, vector<1x128xf32>,
    } else {
    }
    %c1_i32 = arith.constant 1 : i32
    %13 = arith.cmpi eq, %arg0, %c1_i32 : i32
    %14 = arith.extui %13 : i1 to i32
    %c0_i32_7 = arith.constant 0 : i32
    %15 = arith.cmpi ne, %14, %c0_i32_7 : i32
    scf.if %15 {
      %c128_i32 = arith.constant 128 : i32
      %16 = arith.muli %arg1, %c128_i32 : i32
      %17 = tpu.assume_multiple %16, 128 : i32
      %18 = arith.index_cast %17 : i32 to index
      %c0 = arith.constant 0 : index
      %19 = vector.load %arg7[%18, %c0] : memref<128x128xf32, #tpu.memory_space<vmem>>, vector<128x128xf32>
      %c0_8 = arith.constant 0 : index
      %c0_9 = arith.constant 0 : index
      %20 = vector.load %arg8[%c0_8, %c0_9] : memref<1x128xf32, #tpu.memory_space<vmem>>, vector<1x128xf32>
      %21 = vector.broadcast %20 : vector<1x128xf32> to vector<128x128xf32>
      %22 = arith.mulf %19, %21 : vector<128x128xf32>
      %c0_10 = arith.constant 0 : index
      %c0_11 = arith.constant 0 : index
      %23 = vector.load %arg9[%c0_10, %c0_11] : memref<1x128xf32, #tpu.memory_space<vmem>>, vector<1x128xf32>
      %24 = vector.broadcast %23 : vector<1x128xf32> to vector<128x128xf32>
      %25 = arith.addf %22, %24 : vector<128x128xf32>
      %cst = arith.constant 0.000000e+00 : f32
      %26 = vector.broadcast %cst : f32 to vector<128x128xf32>
      %27 = arith.maximumf %25, %26 : vector<128x128xf32>
      %c0_12 = arith.constant 0 : index
      %c0_13 = arith.constant 0 : index
      %28 = vector.load %arg6[%c0_12, %c0_13] : memref<128x128xf32, #tpu.memory_space<vmem>>, vector<128x128xf32>
      tpu.vector_store %arg6[%c0_12, %c0_13], %27 {strides = array<i32>} : memref<128x128xf32, #tpu.memory_space<vmem>>, vector<128x128xf32>,
    } else {
    }
    return
  }
  func.func @transform_0(%arg0: i32, %arg1: i32) -> (i32, i32) {
    %c1_i32 = arith.constant 1 : i32
    %0 = arith.subi %c1_i32, %arg0 : i32
    %1 = arith.muli %arg1, %0 : i32
    %c0_i32 = arith.constant 0 : i32
    %c0_i32_0 = arith.constant 0 : i32
    return %1, %c0_i32 : i32, i32
  }
  func.func @transform_1(%arg0: i32, %arg1: i32) -> (i32, i32) {
    %c0_i32 = arith.constant 0 : i32
    %c0_i32_0 = arith.constant 0 : i32
    %c0_i32_1 = arith.constant 0 : i32
    return %c0_i32, %c0_i32_0 : i32, i32
  }
  func.func @transform_2(%arg0: i32, %arg1: i32) -> (i32, i32) {
    %c0_i32 = arith.constant 0 : i32
    %c0_i32_0 = arith.constant 0 : i32
    %c0_i32_1 = arith.constant 0 : i32
    return %c0_i32, %c0_i32_0 : i32, i32
  }
  func.func @transform_3(%arg0: i32, %arg1: i32) -> (i32, i32) {
    %c0_i32 = arith.constant 0 : i32
    %c0_i32_0 = arith.constant 0 : i32
    %c0_i32_1 = arith.constant 0 : i32
    return %c0_i32, %c0_i32_0 : i32, i32
  }
  func.func @transform_4(%arg0: i32, %arg1: i32) -> (i32, i32) {
    %0 = arith.muli %arg1, %arg0 : i32
    %c0_i32 = arith.constant 0 : i32
    %c0_i32_0 = arith.constant 0 : i32
    return %0, %c0_i32 : i32, i32
  }
}

</mosaic_0001>

<bundles_post_ra>
// kernel: tpu_custom_call.1
= control target key start
LH: loop header
LB: loop body
LE: loop exit
PB: predicated region body
PF: predicated region fallthrough
CT: control target
= control target key end

     0   :  { %9 = vsyncpa [#allocation6], 0  ;;  %s1001_s0 = inlined_call_operand.vmem [shape: f32[128,36], index: 0, kind: input, shape index: {}]   ;;  %s1002_s1 = inlined_call_operand.vmem [shape: f32[36,128], index: 1, kind: input, shape index: {}]   ;;  %s1003_s2 = inlined_call_operand.vmem [shape: f32[1,128], index: 2, kind: input, shape index: {}]   ;;  %s1004_s3 = inlined_call_operand.vmem [shape: f32[1,128], index: 3, kind: input, shape index: {}]   ;;  %s1005_s4 = inlined_call_operand.hbm [shape: f32[128,128], index: 4, kind: output, shape index: {}]  }
   0x1   :  { %11 = vsyncpa [#allocation6 + $0x1], 0  ;;  %s840_s15 = smov 0   ;;  %s842_s16 = smov 0  }
   0x2   :  { %s844_s17 = smov 0  }
   0x3 LB: > { %s669_s18 = sadd.s32 4294967295, %s808_s17   ;;  %s670_s19 = sadd.s32 4294967294, %s808_s17   ;;  %s808_s17 = sphi %s844_s17, %s17_s17   ;;  %s804_s16 = sphi %s842_s16, %s1007_s16   ;;  %s800_s15 = sphi %s840_s15, %s1006_s15  }
   0x4   : > { %s29_s20 = sadd.s32 1, %s804_s16  ;;  %p674_p0 = scmp.ge.s32.totalorder %s808_s17, 1 }
   0x5   : > { %p31_p1 = scmp.ge.s32.totalorder %s29_s20, 2  ;;  %p188_p2 = scmp.lt.s32.totalorder %s808_s17, 3 }
   0x7   : > { %s1009_s20 = smov (%p31_p1, %s29_s20), 0  ;;  %p189_p3 = pnand %p674_p0, %p188_p2 }
   0x8   : > { %p228_p4 = scmp.eq.s32.totalorder (!%p189_p3), %s800_s15, 0 }
   0x9   : > { %192 = sbr.rel (%p189_p3) target bundleno = 448 (0x1c0), region = 36 }
   0xe   : > { %233 = sbr.rel (!%p228_p4) target bundleno = 19 (0x13), region = 40  ;;  %v810_v0 = vmov (%p228_p4), 0.0  }
   0xf   : > { %234 = vst [vmem:[#allocation3] sm:$0x1] (%p228_p4), %v810_v0 }
  0x10   : > { %235 = vst [vmem:[#allocation4] sm:$0x1] (%p228_p4), %v810_v0 }
  0x13 PF: > { %p676_p5 = scmp.ne.s32.totalorder %s800_s15, 0 }
  0x15   : > { %238 = sbr.rel (%p676_p5) target bundleno = 376 (0x178), region = 44 }
  0x1a   : > { %v259_v1 = vld [vmem:[%s1002_s1 + $0x20] sm:$0xf]  ;;  %vm309_vm0 = vcmask 1043456   ;;  %v258_v2 = vld [vmem:[%s1002_s1 + $0x18] sm:$0xff]  ;;  %v257_v3 = vld [vmem:[%s1002_s1 + $0x10] sm:$0xff]  ;;  %vm260_vm1 = vcmask 293888  }
  0x1b   : > { %701 = vmatpush.msk.msra.mxu3 %vm309_vm0, %v259_v1  ;;  %677 = vmatpush.msk.msra.mxu0 %vm309_vm0, %v259_v1  ;;  %v256_v4 = vld [vmem:[%s1002_s1 + $0x8] sm:$0xff]  ;;  %v255_v5 = vld [vmem:[%s1002_s1] sm:$0xff]  ;;  %v249_v6 = vld [vmem:[%s1001_s0 + $0x50] sm:$0xff]  ;;  %v811_v54 = vmov 1.0  }
  0x1c   : > { %700 = vmatpush.msk.msra.mxu1 %vm309_vm0, %v259_v1  ;;  %v239_v7 = vld [vmem:[%s1001_s0] sm:$0xff]  ;;  %v245_v8 = vld [vmem:[%s1001_s0 + $0x30] sm:$0xff]  ;;  %v250_v9 = vld [vmem:[%s1001_s0 + $0x58] sm:$0xff] }
  0x1d   : > { %703 = vmatpush.msra.mxu3 %v258_v2  ;;  %325 = vmatpush.msra.mxu0 %v258_v2  ;;  %v240_v10 = vld [vmem:[%s1001_s0 + $0x8] sm:$0xff]  ;;  %v246_v11 = vld [vmem:[%s1001_s0 + $0x38] sm:$0xff]  ;;  %v251_v12 = vld [vmem:[%s1001_s0 + $0x60] sm:$0xff] }
  0x1e   : > { %702 = vmatpush.msra.mxu1 %v258_v2  ;;  %v241_v13 = vld [vmem:[%s1001_s0 + $0x10] sm:$0xff]  ;;  %v247_v14 = vld [vmem:[%s1001_s0 + $0x40] sm:$0xff]  ;;  %v252_v15 = vld [vmem:[%s1001_s0 + $0x68] sm:$0xff] }
  0x1f   : > { %705 = vmatpush.msra.mxu3 %v257_v3  ;;  %326 = vmatpush.msra.mxu0 %v257_v3  ;;  %v242_v16 = vld [vmem:[%s1001_s0 + $0x18] sm:$0xff]  ;;  %v248_v17 = vld [vmem:[%s1001_s0 + $0x48] sm:$0xff]  ;;  %v253_v18 = vld [vmem:[%s1001_s0 + $0x70] sm:$0xff] }
  0x20   : > { %704 = vmatpush.msra.mxu1 %v257_v3  ;;  %v243_v19 = vld [vmem:[%s1001_s0 + $0x20] sm:$0xff]  ;;  %v254_v20 = vld [vmem:[%s1001_s0 + $0x78] sm:$0xff]  ;;  %v244_v21 = vld [vmem:[%s1001_s0 + $0x28] sm:$0xff] }
  0x21   : > { %707 = vmatpush.msra.mxu3 %v256_v4  ;;  %327 = vmatpush.msra.mxu0 %v256_v4  ;;  %v396_v55 = vld [vmem:[#allocation3] sm:$0x1]  ;;  %v419_v58 = vld [vmem:[#allocation4] sm:$0x1] }
  0x22   : > { %706 = vmatpush.msra.mxu1 %v256_v4 }
  0x23   : > { %709 = vmatpush.msra.mxu3 %v255_v5  ;;  %328 = vmatpush.msra.mxu0 %v255_v5 }
  0x24   : > { %688 = vmatmul.msk.f32.vlgmr.msra.gmra.mxu3 %vm260_vm1, %v249_v6  ;;  %678 = vmatmul.msk.f32.vlgmr.msra.gmra.mxu0 %vm260_vm1, %v239_v7 }
  0x25   : > { %708 = vmatpush.msra.mxu1 %v255_v5 }
  0x26   : > { %684 = vmatmul.msk.f32.vlgmr.msra.gmra.mxu1 %vm260_vm1, %v245_v8 }
  0x2c   : > { %689 = vmatmul.msk.f32.gmra.mxu3 %vm260_vm1, %v250_v9  ;;  %679 = vmatmul.msk.f32.gmra.mxu0 %vm260_vm1, %v240_v10 }
  0x2e   : > { %685 = vmatmul.msk.f32.gmra.mxu1 %vm260_vm1, %v246_v11 }
  0x34   : > { %690 = vmatmul.msk.f32.gmra.mxu3 %vm260_vm1, %v251_v12  ;;  %680 = vmatmul.msk.f32.gmra.mxu0 %vm260_vm1, %v241_v13 }
  0x36   : > { %686 = vmatmul.msk.f32.gmra.mxu1 %vm260_vm1, %v247_v14 }
  0x3c   : > { %691 = vmatmul.msk.f32.gmra.mxu3 %vm260_vm1, %v252_v15  ;;  %681 = vmatmul.msk.f32.gmra.mxu0 %vm260_vm1, %v242_v16 }
  0x3e   : > { %687 = vmatmul.msk.f32.gmra.mxu1 %vm260_vm1, %v248_v17 }
  0x44   : > { %692 = vmatmul.msk.f32.gmra.mxu3 %vm260_vm1, %v253_v18  ;;  %682 = vmatmul.msk.f32.gmra.mxu0 %vm260_vm1, %v243_v19 }
  0x4c   : > { %693 = vmatmul.msk.f32.gmra.mxu3 %vm260_vm1, %v254_v20  ;;  %683 = vmatmul.msk.f32.gmra.mxu0 %vm260_vm1, %v244_v21 }
  0xa1   : > { %v945_v22 = vpop.f32.mrf.mxu0 }
  0xa2   : > { %380 = vst [vmem:[#allocation2 + $0x30] sm:$0xff] %v945_v22  ;;  %v420_v53 = vmul.f32 %v945_v22, %v945_v22 }
  0xa3   : > { %v348_v23 = vpop.f32.mrf.mxu1 }
  0xa4   : > { %386 = vst [vmem:[#allocation2 + $0x8] sm:$0xff] %v348_v23  ;;  %v426_v47 = vmul.f32 %v348_v23, %v348_v23 }
  0xa7   : > { %v360_v24 = vpop.f32.mrf.mxu3 }
  0xa8   : > { %390 = vst [vmem:[#allocation2 + $0x10] sm:$0xff] %v360_v24  ;;  %v430_v43 = vmul.f32 %v360_v24, %v360_v24 }
  0xa9   : > { %v948_v25 = vpop.f32.mrf.mxu0 }
  0xaa   : > { %381 = vst [vmem:[#allocation2] sm:$0xff] %v948_v25  ;;  %v421_v52 = vmul.f32 %v948_v25, %v948_v25 }
  0xab   : > { %v351_v26 = vpop.f32.mrf.mxu1 }
  0xac   : > { %387 = vst [vmem:[#allocation2 + $0x48] sm:$0xff] %v351_v26  ;;  %v427_v46 = vmul.f32 %v351_v26, %v351_v26 }
  0xaf   : > { %v363_v27 = vpop.f32.mrf.mxu3 }
  0xb0   : > { %391 = vst [vmem:[#allocation2 + $0x38] sm:$0xff] %v363_v27  ;;  %v431_v42 = vmul.f32 %v363_v27, %v363_v27 }
  0xb1   : > { %v336_v28 = vpop.f32.mrf.mxu0 }
  0xb2   : > { %382 = vst [vmem:[#allocation2 + $0x58] sm:$0xff] %v336_v28  ;;  %v422_v51 = vmul.f32 %v336_v28, %v336_v28 }
  0xb3   : > { %v354_v29 = vpop.f32.mrf.mxu1 }
  0xb4   : > { %388 = vst [vmem:[#allocation2 + $0x40] sm:$0xff] %v354_v29  ;;  %v428_v45 = vmul.f32 %v354_v29, %v354_v29 }
  0xb7   : > { %v366_v30 = vpop.f32.mrf.mxu3 }
  0xb8   : > { %392 = vst [vmem:[#allocation2 + $0x60] sm:$0xff] %v366_v30  ;;  %v432_v41 = vmul.f32 %v366_v30, %v366_v30 }
  0xb9   : > { %v339_v31 = vpop.f32.mrf.mxu0 }
  0xba   : > { %383 = vst [vmem:[#allocation2 + $0x18] sm:$0xff] %v339_v31  ;;  %v423_v50 = vmul.f32 %v339_v31, %v339_v31 }
  0xbb   : > { %v357_v32 = vpop.f32.mrf.mxu1 }
  0xbc   : > { %389 = vst [vmem:[#allocation2 + $0x20] sm:$0xff] %v357_v32  ;;  %v429_v44 = vmul.f32 %v357_v32, %v357_v32 }
  0xbf   : > { %v369_v33 = vpop.f32.mrf.mxu3 }
  0xc0   : > { %393 = vst [vmem:[#allocation2 + $0x70] sm:$0xff] %v369_v33  ;;  %v433_v40 = vmul.f32 %v369_v33, %v369_v33 }
  0xc1   : > { %v342_v34 = vpop.f32.mrf.mxu0 }
  0xc2   : > { %384 = vst [vmem:[#allocation2 + $0x50] sm:$0xff] %v342_v34  ;;  %v424_v49 = vmul.f32 %v342_v34, %v342_v34 }
  0xc7   : > { %v372_v35 = vpop.f32.mrf.mxu3 }
  0xc8   : > { %394 = vst [vmem:[#allocation2 + $0x78] sm:$0xff] %v372_v35  ;;  %v434_v39 = vmul.f32 %v372_v35, %v372_v35 }
  0xc9   : > { %v345_v36 = vpop.f32.mrf.mxu0 }
  0xca   : > { %385 = vst [vmem:[#allocation2 + $0x68] sm:$0xff] %v345_v36  ;;  %v425_v48 = vmul.f32 %v345_v36, %v345_v36 }
  0xcf   : > { %v375_v37 = vpop.f32.mrf.mxu3 }
  0xd0   : > { %395 = vst [vmem:[#allocation2 + $0x28] sm:$0xff] %v375_v37  ;;  %397 = vmatpush.msrb.mxu1 %v375_v37  ;;  %v435_v38 = vmul.f32 %v375_v37, %v375_v37 }
  0xd2   : > { %398 = vmatpush.msrb.mxu1 %v372_v35  ;;  %436 = vmatpush.msra.mxu2 %v435_v38 }
  0xd4   : > { %399 = vmatpush.msrb.mxu1 %v369_v33  ;;  %437 = vmatpush.msra.mxu2 %v434_v39 }
  0xd6   : > { %400 = vmatpush.msrb.mxu1 %v366_v30  ;;  %438 = vmatpush.msra.mxu2 %v433_v40 }
  0xd8   : > { %401 = vmatpush.msrb.mxu1 %v363_v27  ;;  %439 = vmatpush.msra.mxu2 %v432_v41 }
  0xda   : > { %402 = vmatpush.msrb.mxu1 %v360_v24  ;;  %440 = vmatpush.msra.mxu2 %v431_v42 }
  0xdc   : > { %403 = vmatpush.msrb.mxu1 %v357_v32  ;;  %441 = vmatpush.msra.mxu2 %v430_v43 }
  0xde   : > { %404 = vmatpush.msrb.mxu1 %v354_v29  ;;  %442 = vmatpush.msra.mxu2 %v429_v44 }
  0xe0   : > { %405 = vmatpush.msrb.mxu1 %v351_v26  ;;  %443 = vmatpush.msra.mxu2 %v428_v45 }
  0xe2   : > { %406 = vmatpush.msrb.mxu1 %v348_v23  ;;  %444 = vmatpush.msra.mxu2 %v427_v46 }
  0xe4   : > { %407 = vmatpush.msrb.mxu1 %v345_v36  ;;  %445 = vmatpush.msra.mxu2 %v426_v47 }
  0xe6   : > { %408 = vmatpush.msrb.mxu1 %v342_v34  ;;  %446 = vmatpush.msra.mxu2 %v425_v48 }
  0xe8   : > { %409 = vmatpush.msrb.mxu1 %v339_v31  ;;  %447 = vmatpush.msra.mxu2 %v424_v49 }
  0xea   : > { %410 = vmatpush.msrb.mxu1 %v336_v28  ;;  %448 = vmatpush.msra.mxu2 %v423_v50 }
  0xec   : > { %411 = vmatpush.msrb.mxu1 %v948_v25  ;;  %449 = vmatpush.msra.mxu2 %v422_v51 }
  0xee   : > { %412 = vmatpush.msrb.mxu1 %v945_v22  ;;  %450 = vmatpush.msra.mxu2 %v421_v52 }
  0xef   : > { %413 = vmatmul.f32.vlgmr.msrb.gmra.mxu1 %v811_v54 }
  0xf0   : > { %451 = vmatpush.msra.mxu2 %v420_v53 }
  0xf1   : > { %452 = vmatmul.f32.vlgmr.msra.gmra.mxu2 %v811_v54 }
 0x16c   : > { %v414_v56 = vpop.f32.mrf.mxu1 }
 0x16d   : > { %v417_v57 = vadd.f32 %v414_v56, %v396_v55 }
 0x16f   : > { %418 = vst [vmem:[#allocation3] sm:$0x1] %v417_v57 }
 0x174   : > { %v453_v59 = vpop.f32.mrf.mxu2 }
 0x175   : > { %v456_v60 = vadd.f32 %v453_v59, %v419_v58 }
 0x177   : > { %457 = vst [vmem:[#allocation4] sm:$0x1] %v456_v60 }
 0x178 PF: > { %459 = sbr.rel (!%p228_p4) target bundleno = 414 (0x19e), region = 48  ;;  %v460_v61 = vld [vmem:[#allocation3] sm:$0x1] (%p228_p4) }
 0x179   : > { %v461_v63 = vmul.f32 (%p228_p4), 0.0078125, %v460_v61  ;;  %v466_v9 = vld [vmem:[%s1003_s2] sm:$0x1] (%p228_p4) }
 0x17a   : > { %v480_v13 = vld [vmem:[%s1004_s3] sm:$0x1] (%p228_p4) }
 0x17b   : > { %v464_v1 = vmul.f32 (%p228_p4), %v461_v63, %v461_v63 }
 0x17e   : > { %v462_v62 = vld [vmem:[#allocation4] sm:$0x1] }
 0x17f   : > { %v463_v0 = vmul.f32 0.0078125, %v462_v62 }
 0x181   : > { %v465_v2 = vsub.f32 %v463_v0, %v464_v1 }
 0x183   : > { %v467_v3 = vadd.f32 1e-05, %v465_v2 }
 0x185   : > { %750 = vrsqrt.f32 %v467_v3  ;;  %vm474_vm2 = vweird.f32 %v467_v3 }
 0x18b   : > { %v751_v4 = vpop.eup %750 }
 0x18c   : > { %v469_v5 = vmul.f32 %v751_v4, %v467_v3  ;;  %vm475_vm3 = vweird.f32 %v751_v4 }
 0x18d   : > { %vm476_vm4 = vmor %vm474_vm2, %vm475_vm3 }
 0x18e   : > { %v470_v6 = vmul.f32 %v751_v4, %v469_v5 }
 0x190   : > { %v471_v7 = vmul.f32 0.5, %v470_v6 }
 0x192   : > { %v472_v8 = vsub.f32 1.5, %v471_v7 }
 0x194   : > { %v473_v10 = vmul.f32 %v751_v4, %v472_v8 }
 0x196   : > { %v477_v11 = vsel %vm476_vm4, %v751_v4, %v473_v10 }
 0x197   : > { %v478_v12 = vmul.f32 %v477_v11, %v466_v9 }
 0x199   : > { %479 = vst [vmem:[#allocation3] sm:$0x1] %v478_v12  ;;  %v481_v14 = vmul.f32 %v478_v12, %v461_v63 }
 0x19b   : > { %v482_v15 = vsub.f32 %v480_v13, %v481_v14 }
 0x19d   : > { %483 = vst [vmem:[#allocation4] sm:$0x1] %v482_v15 }
 0x19e PF: > { %p694_p6 = scmp.ne.s32.totalorder %s800_s15, 1 }
 0x1a0   : > { %487 = sbr.rel (%p694_p6) target bundleno = 444 (0x1bc), region = 52 }
 0x1a5   : > { %v490_v16 = vld [vmem:[#allocation2 + $0x30] sm:$0xff]  ;;  %v752_v17 = vld [vmem:[#allocation3] ss:$0 sm:$0xff]  ;;  %v966_v18 = vld [vmem:[#allocation4] ss:$0 sm:$0xff] }
 0x1a6   : > { %v491_v19 = vld [vmem:[#allocation2] sm:$0xff]  ;;  %v510_v20 = vmul.f32 %v752_v17, %v490_v16  ;;  %v492_v22 = vld [vmem:[#allocation2 + $0x58] sm:$0xff]  ;;  %v494_v24 = vld [vmem:[#allocation2 + $0x50] sm:$0xff] }
 0x1a7   : > { %v511_v21 = vmul.f32 %v752_v17, %v491_v19  ;;  %v493_v23 = vld [vmem:[#allocation2 + $0x18] sm:$0xff]  ;;  %v512_v25 = vmul.f32 %v752_v17, %v492_v22  ;;  %v514_v27 = vmul.f32 %v752_v17, %v494_v24  ;;  %v495_v28 = vld [vmem:[#allocation2 + $0x68] sm:$0xff]  ;;  %v498_v39 = vld [vmem:[#allocation2 + $0x40] sm:$0xff] }
 0x1a8   : > { %v513_v26 = vmul.f32 %v752_v17, %v493_v23  ;;  %v496_v29 = vld [vmem:[#allocation2 + $0x8] sm:$0xff]  ;;  %v530_v31 = vadd.f32 %v966_v18, %v510_v20  ;;  %v515_v33 = vmul.f32 %v752_v17, %v495_v28  ;;  %v499_v40 = vld [vmem:[#allocation2 + $0x20] sm:$0xff]  ;;  %v500_v45 = vld [vmem:[#allocation2 + $0x10] sm:$0xff]  ;;  %v518_v55 = vmul.f32 %v752_v17, %v498_v39 }
 0x1a9   : > { %v497_v30 = vld [vmem:[#allocation2 + $0x48] sm:$0xff]  ;;  %v531_v32 = vadd.f32 %v966_v18, %v511_v21  ;;  %v516_v34 = vmul.f32 %v752_v17, %v496_v29  ;;  %v532_v35 = vadd.f32 %v966_v18, %v512_v25  ;;  %v534_v37 = vadd.f32 %v966_v18, %v514_v27  ;;  %v501_v46 = vld [vmem:[#allocation2 + $0x38] sm:$0xff]  ;;  %v502_v47 = vld [vmem:[#allocation2 + $0x60] sm:$0xff] }
 0x1aa   : > { %v533_v36 = vadd.f32 %v966_v18, %v513_v26  ;;  %v517_v38 = vmul.f32 %v752_v17, %v497_v30  ;;  %v546_v41 = vmax.f32 %v530_v31, 0.0  ;;  %v535_v43 = vadd.f32 %v966_v18, %v515_v33  ;;  %v503_v51 = vld [vmem:[#allocation2 + $0x70] sm:$0xff]  ;;  %v504_v52 = vld [vmem:[#allocation2 + $0x78] sm:$0xff]  ;;  %v505_v57 = vld [vmem:[#allocation2 + $0x28] sm:$0xff] }
 0x1ab   : > { %v547_v42 = vmax.f32 %v531_v32, 0.0  ;;  %v536_v44 = vadd.f32 %v966_v18, %v516_v34  ;;  %v548_v48 = vmax.f32 %v532_v35, 0.0  ;;  %v550_v53 = vmax.f32 %v534_v37, 0.0 }
 0x1ac   : > { %v549_v49 = vmax.f32 %v533_v36, 0.0  ;;  %v537_v50 = vadd.f32 %v966_v18, %v517_v38  ;;  %562 = vst [vmem:[#allocation5] sm:$0xff] %v546_v41  ;;  %v551_v54 = vmax.f32 %v535_v43, 0.0  ;;  %v519_v56 = vmul.f32 %v752_v17, %v499_v40 }
 0x1ad   : > { %563 = vst [vmem:[#allocation5 + $0x8] sm:$0xff] %v547_v42  ;;  %v552_v58 = vmax.f32 %v536_v44, 0.0  ;;  %v520_v59 = vmul.f32 %v752_v17, %v500_v45  ;;  %v521_v60 = vmul.f32 %v752_v17, %v501_v46  ;;  %v522_v61 = vmul.f32 %v752_v17, %v502_v47 }
 0x1ae   : > { %564 = vst [vmem:[#allocation5 + $0x10] sm:$0xff] %v548_v48  ;;  %v538_v62 = vadd.f32 %v966_v18, %v518_v55  ;;  %v539_v63 = vadd.f32 %v966_v18, %v519_v56  ;;  %v523_v0 = vmul.f32 %v752_v17, %v503_v51  ;;  %v524_v1 = vmul.f32 %v752_v17, %v504_v52 }
 0x1af   : > { %565 = vst [vmem:[#allocation5 + $0x18] sm:$0xff] %v549_v49  ;;  %v553_v2 = vmax.f32 %v537_v50, 0.0  ;;  %v540_v3 = vadd.f32 %v966_v18, %v520_v59  ;;  %v541_v4 = vadd.f32 %v966_v18, %v521_v60  ;;  %v525_v5 = vmul.f32 %v752_v17, %v505_v57 }
 0x1b0   : > { %566 = vst [vmem:[#allocation5 + $0x20] sm:$0xff] %v550_v53  ;;  %v554_v6 = vmax.f32 %v538_v62, 0.0  ;;  %v542_v7 = vadd.f32 %v966_v18, %v522_v61  ;;  %v555_v8 = vmax.f32 %v539_v63, 0.0  ;;  %v543_v9 = vadd.f32 %v966_v18, %v523_v0 }
 0x1b1   : > { %567 = vst [vmem:[#allocation5 + $0x28] sm:$0xff] %v551_v54  ;;  %v556_v10 = vmax.f32 %v540_v3, 0.0  ;;  %v544_v11 = vadd.f32 %v966_v18, %v524_v1  ;;  %v557_v12 = vmax.f32 %v541_v4, 0.0  ;;  %v545_v13 = vadd.f32 %v966_v18, %v525_v5 }
 0x1b2   : > { %568 = vst [vmem:[#allocation5 + $0x30] sm:$0xff] %v552_v58  ;;  %v558_v14 = vmax.f32 %v542_v7, 0.0  ;;  %v559_v15 = vmax.f32 %v543_v9, 0.0 }
 0x1b3   : > { %569 = vst [vmem:[#allocation5 + $0x38] sm:$0xff] %v553_v2  ;;  %v560_v16 = vmax.f32 %v544_v11, 0.0  ;;  %v561_v17 = vmax.f32 %v545_v13, 0.0 }
 0x1b4   : > { %570 = vst [vmem:[#allocation5 + $0x40] sm:$0xff] %v554_v6 }
 0x1b5   : > { %571 = vst [vmem:[#allocation5 + $0x48] sm:$0xff] %v555_v8 }
 0x1b6   : > { %572 = vst [vmem:[#allocation5 + $0x50] sm:$0xff] %v556_v10 }
 0x1b7   : > { %573 = vst [vmem:[#allocation5 + $0x58] sm:$0xff] %v557_v12 }
 0x1b8   : > { %574 = vst [vmem:[#allocation5 + $0x60] sm:$0xff] %v558_v14 }
 0x1b9   : > { %575 = vst [vmem:[#allocation5 + $0x68] sm:$0xff] %v559_v15 }
 0x1ba   : > { %576 = vst [vmem:[#allocation5 + $0x70] sm:$0xff] %v560_v16 }
 0x1bb   : > { %577 = vst [vmem:[#allocation5 + $0x78] sm:$0xff] %v561_v17 }
 0x1bc PF: > { %p718_p7 = scmp.eq.s32.totalorder %s669_s18, 1  ;;  %s594_s28 = sshll.u32 %s1005_s4, 4  ;;  %s595_s28 = int_to_ptr.hbm [resolvable:$true] %s594_s28 }
 0x1bd   : > { %s812_s29 = smov [#allocation5]   ;;  %s813_s5 = smov 128  }
 0x1be   : > { %s592_s30 = sshll.u32 %s812_s29, 4  ;;  %s814_s6 = smov 8   ;;  %s593_s30 = int_to_ptr.vmem [resolvable:$true] %s592_s30 }
 0x1bf   : > { %711 = dma.vmem_to_hbm [thread:$0]  (%p718_p7), %s593_s30, 2048, %s595_s28, [#allocation6], %s813_s5, %s813_s5, %s814_s6  }
 0x1c0 PF: > { %p719_p8 = scmp.ge.s32.totalorder %s808_s17, 2  ;;  %p720_p9 = scmp.eq.s32.totalorder %s670_s19, 1 }
 0x1c2   : > { %p715_p10 = pnand %p720_p9, %p719_p8 }
 0x1c4   : > { %p716_p11 = pneg %p715_p10 }
 0x1c6   : > { %795 = dma.done.wait (%p716_p11), [#allocation6], 2048  }
 0x1c7   : > { %797 = vsyncadd (%p716_p11), [#allocation6], 4294965248  ;;  %s17_s17 = sadd.s32 1, %s808_s17   ;;  %s1006_s15 = smov %s804_s16 }
 0x1c8   : > { %p14_p12 = scmp.ge.s32.totalorder %s17_s17, 4   ;;  %s1007_s16 = smov %s1009_s20 }
 0x1ca   :  { %16 = sbr.rel (!%p14_p12) target bundleno = 3 (0x3), region = 89 }
 0x1cf   :  { %616 = vsyncpa [#allocation6], 1 }
 0x1d0   :  { %618 = vsyncpa [#allocation6 + $0x1], 1 }

</bundles_post_ra>
